<compile_context>
chip_gen: v6e
topology: v6e:2x2x1
jax: 0.10.0
libtpu: 0.0.40
codegen_flags: <defaults>
</compile_context>

<pallas_src>
import functools

import jax
import jax.numpy as jnp
from jax.experimental import pallas as pl
from jax.experimental.pallas import tpu as pltpu


_LANE = 128
_SUBLANE = 32            # multiple-of-32 batch blocks are safe for any dtype
_VMEM_BUDGET = 24 << 20  # double-buffered working-set budget (fits v7x 64 MiB)
_VMEM_LIMIT = 32 << 20   # scoped VMEM limit (raises v5e's 16 MiB default)


def _round_up(x, m):
    return ((x + m - 1) // m) * m


def _mixing_kernel(q_ref, w1_ref, b1_ref, w2t_ref, b2_ref, o_ref, *, M, A, H1, H2):
    q = q_ref[...].astype(jnp.float32)      # (BB, M*A)
    w1 = w1_ref[...].astype(jnp.float32)    # (BB, A*H1)   lane-dense slab
    b1 = b1_ref[...].astype(jnp.float32)    # (BB, H1)
    w2t = w2t_ref[...].astype(jnp.float32)  # (BB, H2*H1)  output-column-major
    b2 = b2_ref[...].astype(jnp.float32)    # (BB, H2)

    for m in range(M):  # M is typically 1; static unroll
        # Layer 1: h[b,h1] = relu(b1[b,h1] + sum_a q[b,m,a] * w1[b,a,h1])  (VPU)
        h = b1
        for a in range(A):  # A = num_agents, small; static unroll
            qa = q[:, m * A + a: m * A + a + 1]          # (BB, 1) lane-broadcast
            h = h + qa * w1[:, a * H1:(a + 1) * H1]      # (BB, H1)
        h = jnp.maximum(h, 0.0)
        # Layer 2: out[b,j] = sum_h1 h[b,h1] * w2[b,h1,j] + b2[b,j]  (VPU + XLU)
        for j in range(H2):  # H2 typically 1; static unroll
            w2j = w2t[:, j * H1:(j + 1) * H1]            # (BB, H1)
            col = jnp.sum(h * w2j, axis=-1, keepdims=True) + b2[:, j:j + 1]
            # Direct lane-slice store: avoids concatenating 1-lane columns.
            o_ref[:, m * H2 + j: m * H2 + j + 1] = col.astype(o_ref.dtype)


def mixing_network_forward(q_values, w1, b1, w2, b2, *, block_b=2048):
    """Pallas implementation of Mixing_Network.forward. Returns a flat vector."""
    B, M, A = q_values.shape
    H1 = w1.shape[-1]
    H2 = w2.shape[-1]
    out_dtype = q_values.dtype

    # --- wrapper-side layout plumbing: lane-dense 2-D, batch on sublanes -----
    # All reshapes below are bitcast-free for the contiguous QMIX layouts; the
    # w2 swapaxes is degenerate (size-1 axis) for the usual H2 == 1 case.
    q2 = q_values.reshape(B, M * A)
    w1f = w1.reshape(B, A * H1)                         # (B, 128) for A=4, H1=32
    b1f = b1.reshape(B, H1)
    w2t = jnp.swapaxes(w2, 1, 2).reshape(B, H2 * H1)    # per-output-column slabs
    b2f = b2.reshape(B, H2)

    # --- batch-block size -----------------------------------------------------
    lane_dims = (M * A, A * H1, H1, H2 * H1, H2, M * H2)
    # VMEM bytes per batch row: every operand pads its lane dim up to 128.
    row_bytes = sum(_round_up(d, _LANE) * 4 for d in lane_dims)
    bb_cap = max(_SUBLANE, (_VMEM_BUDGET // (2 * row_bytes)) // _SUBLANE * _SUBLANE)

    BB = min(_round_up(block_b, _SUBLANE), bb_cap, _round_up(B, _SUBLANE))
    # v7x megacore: ensure >= 2 grid steps for large batches so the "parallel"
    # axis can shard across both TensorCores (no effect on single-TC v5e/v6e).
    if B > 2048:
        BB = min(BB, _round_up(pl.cdiv(B, 2), _SUBLANE))
    BB = max(BB, _SUBLANE)

    # Ragged tail handled by Pallas boundary masking -> no jnp.pad HBM pass.
    grid = (pl.cdiv(B, BB),)
    kernel = functools.partial(_mixing_kernel, M=M, A=A, H1=H1, H2=H2)

    flops = 2 * B * M * H1 * (A + H2) + B * M * (H1 + H2)
    bytes_accessed = int(
        sum(x.size * x.dtype.itemsize for x in (q2, w1f, b1f, w2t, b2f))
        + B * M * H2 * jnp.dtype(out_dtype).itemsize
    )

    out = pl.pallas_call(
        kernel,
        out_shape=jax.ShapeDtypeStruct((B, M * H2), out_dtype),
        grid=grid,
        in_specs=[
            pl.BlockSpec((BB, M * A), lambda i: (i, 0)),
            pl.BlockSpec((BB, A * H1), lambda i: (i, 0)),
            pl.BlockSpec((BB, H1), lambda i: (i, 0)),
            pl.BlockSpec((BB, H2 * H1), lambda i: (i, 0)),
            pl.BlockSpec((BB, H2), lambda i: (i, 0)),
        ],
        out_specs=pl.BlockSpec((BB, M * H2), lambda i: (i, 0)),
        compiler_params=pltpu.CompilerParams(
            dimension_semantics=("parallel",),
            vmem_limit_bytes=_VMEM_LIMIT,
        ),
        cost_estimate=pl.CostEstimate(
            flops=flops, transcendentals=0, bytes_accessed=bytes_accessed
        ),
    )(q2, w1f, b1f, w2t, b2f)

    # output.view(-1): row-major flatten of the (B, M, H2) result.
    return out.reshape(-1)


def _reference_forward(q_values, w1, b1, w2, b2):
    x = jnp.maximum(jnp.einsum("bma,bah->bmh", q_values, w1) + b1, 0.0)
    out = jnp.einsum("bmh,bho->bmo", x, w2) + b2
    return out.reshape(-1)


if __name__ == "__main__":
    # num_agents = 4, mix_net_out = [32, 1]; one q-row per batch element (QMIX).
    A, H1, H2, M = 4, 32, 1, 1

    def make_inputs(key, B):
        kq, k1, kb1, k2, kb2 = jax.random.split(key, 5)
        q = jax.random.normal(kq, (B, M, A), dtype=jnp.float32)
        # Hypernetwork weights are abs()'d in QMIX for monotonicity; forward
        # math is unaffected, this just gives realistic deterministic values.
        w1 = jnp.abs(jax.random.normal(k1, (B, A, H1), dtype=jnp.float32))
        b1 = jax.random.normal(kb1, (B, 1, H1), dtype=jnp.float32)
        w2 = jnp.abs(jax.random.normal(k2, (B, H1, H2), dtype=jnp.float32))
        b2 = jax.random.normal(kb2, (B, 1, H2), dtype=jnp.float32)
        return q, w1, b1, w2, b2

    key = jax.random.PRNGKey(0)
    k_small, k_ragged, k_big = jax.random.split(key, 3)

    # Small spec-sized case: batch = 2 (single partial block).
    args_small = make_inputs(k_small, 2)
    out_small = jax.block_until_ready(mixing_network_forward(*args_small))
    ref_small = _reference_forward(*args_small)
    assert out_small.shape == ref_small.shape, (out_small.shape, ref_small.shape)
    assert jnp.allclose(out_small, ref_small, atol=1e-5, rtol=1e-5)

    # Ragged batch, single block, no padding copy.
    args_rag = make_inputs(k_ragged, 1027)
    out_rag = jax.block_until_ready(mixing_network_forward(*args_rag))
    ref_rag = _reference_forward(*args_rag)
    assert out_rag.shape == ref_rag.shape, (out_rag.shape, ref_rag.shape)
    assert jnp.allclose(out_rag, ref_rag, atol=1e-4, rtol=1e-4)

    # Multi-block grid (megacore split) + ragged final block.
    args_big = make_inputs(k_big, 4100)
    out_big = jax.block_until_ready(
        mixing_network_forward(*args_big, block_b=2048)
    )
    ref_big = _reference_forward(*args_big)
    assert out_big.shape == ref_big.shape, (out_big.shape, ref_big.shape)
    assert jnp.allclose(out_big, ref_big, atol=1e-4, rtol=1e-4)

    print("KERNEL_OK")
</pallas_src>

<mosaic_0001>
module attributes {stable_mosaic.version = 11 : i64} {
  func.func @_mixing_kernel(%arg0: i32, %arg1: memref<32x4xf32, #tpu.memory_space<vmem>>, %arg2: memref<32x128xf32, #tpu.memory_space<vmem>>, %arg3: memref<32x32xf32, #tpu.memory_space<vmem>>, %arg4: memref<32x32xf32, #tpu.memory_space<vmem>>, %arg5: memref<32x1xf32, #tpu.memory_space<vmem>>, %arg6: memref<32x1xf32, #tpu.memory_space<vmem>>) attributes {dimension_semantics = [#tpu.dimension_semantics<parallel>], iteration_bounds = array<i64: 1>, scalar_prefetch = 0 : i64, scratch_operands = 0 : i64, tpu.core_type = #tpu.core_type<tc>, window_params = [{transform_indices = @transform_0, window_bounds = array<i64: 32, 4>}, {transform_indices = @transform_1, window_bounds = array<i64: 32, 128>}, {transform_indices = @transform_2, window_bounds = array<i64: 32, 32>}, {transform_indices = @transform_3, window_bounds = array<i64: 32, 32>}, {transform_indices = @transform_4, window_bounds = array<i64: 32, 1>}, {transform_indices = @transform_5, window_bounds = array<i64: 32, 1>}]} {
    %c0 = arith.constant 0 : index
    %c0_0 = arith.constant 0 : index
    %0 = vector.load %arg1[%c0, %c0_0] : memref<32x4xf32, #tpu.memory_space<vmem>>, vector<32x4xf32>
    %c0_1 = arith.constant 0 : index
    %c0_2 = arith.constant 0 : index
    %1 = vector.load %arg2[%c0_1, %c0_2] : memref<32x128xf32, #tpu.memory_space<vmem>>, vector<32x128xf32>
    %c0_3 = arith.constant 0 : index
    %c0_4 = arith.constant 0 : index
    %2 = vector.load %arg3[%c0_3, %c0_4] : memref<32x32xf32, #tpu.memory_space<vmem>>, vector<32x32xf32>
    %c0_5 = arith.constant 0 : index
    %c0_6 = arith.constant 0 : index
    %3 = vector.load %arg4[%c0_5, %c0_6] : memref<32x32xf32, #tpu.memory_space<vmem>>, vector<32x32xf32>
    %c0_7 = arith.constant 0 : index
    %c0_8 = arith.constant 0 : index
    %4 = vector.load %arg5[%c0_7, %c0_8] : memref<32x1xf32, #tpu.memory_space<vmem>>, vector<32x1xf32>
    %5 = vector.extract_strided_slice %0 {offsets = [0, 0], sizes = [32, 1], strides = [1, 1]} : vector<32x4xf32> to vector<32x1xf32>
    %6 = vector.extract_strided_slice %1 {offsets = [0, 0], sizes = [32, 32], strides = [1, 1]} : vector<32x128xf32> to vector<32x32xf32>
    %7 = vector.broadcast %5 : vector<32x1xf32> to vector<32x32xf32>
    %8 = arith.mulf %7, %6 : vector<32x32xf32>
    %9 = arith.addf %2, %8 : vector<32x32xf32>
    %10 = vector.extract_strided_slice %0 {offsets = [0, 1], sizes = [32, 1], strides = [1, 1]} : vector<32x4xf32> to vector<32x1xf32>
    %11 = vector.extract_strided_slice %1 {offsets = [0, 32], sizes = [32, 32], strides = [1, 1]} : vector<32x128xf32> to vector<32x32xf32>
    %12 = vector.broadcast %10 : vector<32x1xf32> to vector<32x32xf32>
    %13 = arith.mulf %12, %11 : vector<32x32xf32>
    %14 = arith.addf %9, %13 : vector<32x32xf32>
    %15 = vector.extract_strided_slice %0 {offsets = [0, 2], sizes = [32, 1], strides = [1, 1]} : vector<32x4xf32> to vector<32x1xf32>
    %16 = vector.extract_strided_slice %1 {offsets = [0, 64], sizes = [32, 32], strides = [1, 1]} : vector<32x128xf32> to vector<32x32xf32>
    %17 = vector.broadcast %15 : vector<32x1xf32> to vector<32x32xf32>
    %18 = arith.mulf %17, %16 : vector<32x32xf32>
    %19 = arith.addf %14, %18 : vector<32x32xf32>
    %20 = vector.extract_strided_slice %0 {offsets = [0, 3], sizes = [32, 1], strides = [1, 1]} : vector<32x4xf32> to vector<32x1xf32>
    %21 = vector.extract_strided_slice %1 {offsets = [0, 96], sizes = [32, 32], strides = [1, 1]} : vector<32x128xf32> to vector<32x32xf32>
    %22 = vector.broadcast %20 : vector<32x1xf32> to vector<32x32xf32>
    %23 = arith.mulf %22, %21 : vector<32x32xf32>
    %24 = arith.addf %19, %23 : vector<32x32xf32>
    %cst = arith.constant 0.000000e+00 : f32
    %25 = vector.broadcast %cst : f32 to vector<32x32xf32>
    %26 = arith.maximumf %24, %25 : vector<32x32xf32>
    %27 = arith.mulf %26, %3 : vector<32x32xf32>
    %cst_9 = arith.constant dense<0.000000e+00> : vector<32xf32>
    %28 = vector.multi_reduction <add>, %27, %cst_9 [1] : vector<32x32xf32> to vector<32xf32>
    %29 = vector.shape_cast %28 : vector<32xf32> to vector<32x1xf32>
    %30 = arith.addf %29, %4 : vector<32x1xf32>
    %c0_10 = arith.constant 0 : index
    %c0_11 = arith.constant 0 : index
    %31 = vector.load %arg6[%c0_10, %c0_11] : memref<32x1xf32, #tpu.memory_space<vmem>>, vector<32x1xf32>
    tpu.vector_store %arg6[%c0_10, %c0_11], %30 {strides = array<i32>} : memref<32x1xf32, #tpu.memory_space<vmem>>, vector<32x1xf32>,
    return
  }
  func.func @transform_0(%arg0: i32) -> (i32, i32) {
    %c0_i32 = arith.constant 0 : i32
    %c0_i32_0 = arith.constant 0 : i32
    return %arg0, %c0_i32 : i32, i32
  }
  func.func @transform_1(%arg0: i32) -> (i32, i32) {
    %c0_i32 = arith.constant 0 : i32
    %c0_i32_0 = arith.constant 0 : i32
    return %arg0, %c0_i32 : i32, i32
  }
  func.func @transform_2(%arg0: i32) -> (i32, i32) {
    %c0_i32 = arith.constant 0 : i32
    %c0_i32_0 = arith.constant 0 : i32
    return %arg0, %c0_i32 : i32, i32
  }
  func.func @transform_3(%arg0: i32) -> (i32, i32) {
    %c0_i32 = arith.constant 0 : i32
    %c0_i32_0 = arith.constant 0 : i32
    return %arg0, %c0_i32 : i32, i32
  }
  func.func @transform_4(%arg0: i32) -> (i32, i32) {
    %c0_i32 = arith.constant 0 : i32
    %c0_i32_0 = arith.constant 0 : i32
    return %arg0, %c0_i32 : i32, i32
  }
  func.func @transform_5(%arg0: i32) -> (i32, i32) {
    %c0_i32 = arith.constant 0 : i32
    %c0_i32_0 = arith.constant 0 : i32
    return %arg0, %c0_i32 : i32, i32
  }
}

</mosaic_0001>

<bundles_post_ra>
// kernel: tpu_custom_call.1
= control target key start
LH: loop header
LB: loop body
LE: loop exit
PB: predicated region body
PF: predicated region fallthrough
CT: control target
= control target key end

     0   :  { %v276_v1 = vmov 3   ;;  %v277_v2 = vmov 1   ;;  %v278_v6 = vmov 2   ;;  %v279_v7 = vmov 0   ;;  %s280_s27 = smov 96   ;;  %s281_s28 = smov 32   ;;  %s375_s0 = inlined_call_operand.vmem [shape: f32[2,4], index: 0, kind: input, shape index: {}]   ;;  %s376_s1 = inlined_call_operand.vmem [shape: f32[2,128], index: 1, kind: input, shape index: {}]   ;;  %s377_s2 = inlined_call_operand.vmem [shape: f32[2,32], index: 2, kind: input, shape index: {}]   ;;  %s378_s3 = inlined_call_operand.vmem [shape: f32[2,32], index: 3, kind: input, shape index: {}]   ;;  %s379_s4 = inlined_call_operand.vmem [shape: f32[2,1], index: 4, kind: input, shape index: {}]   ;;  %s380_s5 = inlined_call_operand.vmem [shape: f32[2,1], index: 5, kind: output, shape index: {}]  }
   0x1   :  { %v20_v0 = vld [vmem:[%s375_s0] sm:$0xff]  ;;  %267 = vset.pattern.permute.xlu1 %v276_v1  ;;  %266 = vset.pattern.permute.xlu0 %v277_v2  ;;  %v23_v3 = vld [vmem:[%s375_s0 + $0x18] sm:$0xff]  ;;  %v21_v4 = vld [vmem:[%s375_s0 + $0x8] sm:$0xff]  ;;  %s282_s8 = smov 64   ;;  %vm196_vm0 = vcmask 261120   ;;  %vm213_vm1 = vcmask 7168  }
   0x2   :  { %149 = vperm.xlu1 %267, %v20_v0   ;;  %69 = vperm.xlu0 %266, %v20_v0   ;;  %v22_v5 = vld [vmem:[%s375_s0 + $0x10] sm:$0xff]  ;;  %v24_v8 = vld [vmem:[%s376_s1] sm:$0xff]  ;;  %v25_v20 = vld [vmem:[%s376_s1 + $0x8] sm:$0xff] }
   0x3   :  { %v26_v15 = vld [vmem:[%s376_s1 + $0x10] sm:$0xff]  ;;  %v27_v23 = vld [vmem:[%s376_s1 + $0x18] sm:$0xff]  ;;  %v28_v41 = vld [vmem:[%s377_s2] sm:$0xff] }
   0x4   :  { %v32_v51 = vld [vmem:[%s378_s3] sm:$0xff]  ;;  %v29_v54 = vld [vmem:[%s377_s2 + $0x8] sm:$0xff]  ;;  %v30_v57 = vld [vmem:[%s377_s2 + $0x10] sm:$0xff] }
   0x5   :  { %v31_v63 = vld [vmem:[%s377_s2 + $0x18] sm:$0xff] }
   0x6   :  { %268 = vset.pattern.permute.xlu1 %v277_v2  ;;  %81 = vperm.xlu0 %266, %v23_v3  }
   0x7   :  { %73 = vperm.xlu1 %268, %v21_v4  }
   0xa   :  { %269 = vset.pattern.permute.xlu0 %v278_v6 }
   0xb   :  { %77 = vperm.xlu1 %268, %v22_v5   ;;  %109 = vperm.xlu0 %269, %v20_v0  }
   0xf   :  { %270 = vset.pattern.permute.xlu1 %v278_v6  ;;  %121 = vperm.xlu0 %269, %v23_v3  }
  0x10   :  { %113 = vperm.xlu1 %270, %v21_v4  }
  0x13   :  { %272 = vset.pattern.permute.xlu0 %v276_v1 }
  0x14   :  { %117 = vperm.xlu1 %270, %v22_v5   ;;  %161 = vperm.xlu0 %272, %v23_v3  }
  0x18   :  { %271 = vset.pattern.permute.xlu1 %v276_v1  ;;  %274 = vset.pattern.permute.xlu0 %v279_v7 }
  0x19   :  { %153 = vperm.xlu1 %271, %v21_v4   ;;  %52 = vperm.xlu0 %274, %v22_v5  }
  0x1d   :  { %157 = vperm.xlu1 %271, %v22_v5   ;;  %275 = vset.pattern.permute.xlu0 %v276_v1 }
  0x21   :  { %273 = vset.pattern.permute.xlu1 %v279_v7 }
  0x22   :  { %42 = vperm.xlu1 %273, %v20_v0  }
  0x26   :  { %47 = vperm.xlu1 %273, %v21_v4  }
  0x2a   :  { %57 = vperm.xlu1 %273, %v23_v3  }
  0x7d   :  { %v70_v9 = vpop.permute.xlu0 %69  ;;  %v150_v10 = vpop.permute.xlu1 %149 }
  0x7e   :  { %v84_v11 = vmul.f32 %v70_v9, %v24_v8  ;;  %v164_v13 = vmul.f32 %v150_v10, %v24_v8 }
  0x80   :  { %92 = vrot.lane.b32.xlu1 %v84_v11, %s280_s27 }
  0x81   :  { %v82_v12 = vpop.permute.xlu0 %81 }
  0x82   :  { %v74_v14 = vpop.permute.xlu1 %73  ;;  %v87_v26 = vmul.f32 %v82_v12, %v27_v23  ;;  %v33_v12 = vld [vmem:[%s378_s3 + $0x8] sm:$0xff] }
  0x83   :  { %v85_v21 = vmul.f32 %v74_v14, %v25_v20 }
  0x84   :  { %172 = vrot.lane.b32.xlu1 %v164_v13, %s281_s28 }
  0x86   :  { %v78_v16 = vpop.permute.xlu1 %77  ;;  %v110_v17 = vpop.permute.xlu0 %109 }
  0x87   :  { %v86_v18 = vmul.f32 %v78_v16, %v26_v15  ;;  %v124_v19 = vmul.f32 %v110_v17, %v24_v8  ;;  %v34_v17 = vld [vmem:[%s378_s3 + $0x10] sm:$0xff] }
  0x89   :  { %96 = vrot.lane.b32.xlu1 %v86_v18, %s280_s27  ;;  %132 = vrot.lane.b32.xlu0 %v124_v19, %s282_s8 }
  0x8a   :  { %v122_v25 = vpop.permute.xlu0 %121 }
  0x8b   :  { %v114_v22 = vpop.permute.xlu1 %113  ;;  %v127_v28 = vmul.f32 %v122_v25, %v27_v23 }
  0x8c   :  { %v125_v24 = vmul.f32 %v114_v22, %v25_v20 }
  0x8d   :  { %94 = vrot.lane.b32.xlu0 %v85_v21, %s280_s27  ;;  %v35_v21 = vld [vmem:[%s378_s3 + $0x18] sm:$0xff] }
  0x8e   :  { %134 = vrot.lane.b32.xlu1 %v125_v24, %s282_s8 }
  0x8f   :  { %v118_v27 = vpop.permute.xlu1 %117  ;;  %v162_v32 = vpop.permute.xlu0 %161 }
  0x90   :  { %v126_v29 = vmul.f32 %v118_v27, %v26_v15  ;;  %v167_v35 = vmul.f32 %v162_v32, %v27_v23 }
  0x91   :  { %98 = vrot.lane.b32.xlu0 %v87_v26, %s280_s27 }
  0x92   :  { %138 = vrot.lane.b32.xlu1 %v127_v28, %s282_s8  ;;  %v36_v28 = vld [vmem:[%s379_s4] sm:$0xff] }
  0x94   :  { %v154_v30 = vpop.permute.xlu1 %153  ;;  %v53_v42 = vpop.permute.xlu0 %52 }
  0x95   :  { %v165_v31 = vmul.f32 %v154_v30, %v25_v20  ;;  %136 = vrot.lane.b32.xlu0 %v126_v29, %s282_s8  ;;  %v62_v55 = vmul.f32 %v53_v42, %v26_v15 }
  0x97   :  { %v66_v0 = vadd.f32 %v62_v55, %v30_v57 }
  0x98   :  { %v158_v33 = vpop.permute.xlu1 %157 }
  0x99   :  { %v166_v34 = vmul.f32 %v158_v33, %v26_v15  ;;  %174 = vrot.lane.b32.xlu0 %v165_v31, %s281_s28 }
  0x9b   :  { %176 = vrot.lane.b32.xlu1 %v166_v34, %s281_s28 }
  0x9d   :  { %178 = vrot.lane.b32.xlu0 %v167_v35, %s281_s28  ;;  %v43_v36 = vpop.permute.xlu1 %42 }
  0x9e   :  { %v60_v39 = vmul.f32 %v43_v36, %v24_v8 }
  0xa0   :  { %v64_v43 = vadd.f32 %v60_v39, %v28_v41 }
  0xa1   :  { %v48_v37 = vpop.permute.xlu1 %47 }
  0xa2   :  { %v61_v52 = vmul.f32 %v48_v37, %v25_v20 }
  0xa4   :  { %v65_v61 = vadd.f32 %v61_v52, %v29_v54 }
  0xa5   :  { %v58_v38 = vpop.permute.xlu1 %57 }
  0xa6   :  { %v63_v60 = vmul.f32 %v58_v38, %v27_v23 }
  0xa8   :  { %v67_v3 = vadd.f32 %v63_v60, %v31_v63 }
  0xf2   :  { %v93_v40 = vpop.permute.xlu1 %92 }
  0xf3   :  { %v104_v45 = vadd.f32 %v93_v40, %v64_v43 }
  0xf6   :  { %v173_v44 = vpop.permute.xlu1 %172 }
  0xfb   :  { %v133_v46 = vpop.permute.xlu0 %132  ;;  %v97_v48 = vpop.permute.xlu1 %96 }
  0xfc   :  { %v144_v47 = vadd.f32 %v133_v46, %v104_v45  ;;  %v106_v5 = vadd.f32 %v97_v48, %v66_v0 }
  0xfe   :  { %v184_v49 = vadd.f32 %v173_v44, %v144_v47 }
  0xff   :  { %v95_v50 = vpop.permute.xlu0 %94 }
 0x100   :  { %v188_v53 = vmax.f32 %v184_v49, 0.0  ;;  %v135_v58 = vpop.permute.xlu1 %134  ;;  %v105_v1 = vadd.f32 %v95_v50, %v65_v61 }
 0x102   :  { %v192_v56 = vmul.f32 %v188_v53, %v32_v51  ;;  %v145_v6 = vadd.f32 %v135_v58, %v105_v1 }
 0x103   :  { %v99_v59 = vpop.permute.xlu0 %98 }
 0x104   :  { %v197_v62 = vsel %vm196_vm0, %v192_v56, 0.0  ;;  %v139_v4 = vpop.permute.xlu1 %138  ;;  %v107_v7 = vadd.f32 %v99_v59, %v67_v3 }
 0x105   :  { %198 = vadd.xlane.f32.xlu1 %v197_v62 }
 0x106   :  { %v147_v13 = vadd.f32 %v139_v4, %v107_v7 }
 0x107   :  { %v137_v2 = vpop.permute.xlu0 %136 }
 0x108   :  { %v146_v9 = vadd.f32 %v137_v2, %v106_v5 }
 0x10b   :  { %v175_v8 = vpop.permute.xlu0 %174 }
 0x10c   :  { %v185_v10 = vadd.f32 %v175_v8, %v145_v6 }
 0x10d   :  { %v177_v11 = vpop.permute.xlu1 %176 }
 0x10e   :  { %v189_v14 = vmax.f32 %v185_v10, 0.0  ;;  %v186_v15 = vadd.f32 %v177_v11, %v146_v9 }
 0x10f   :  { %v179_v16 = vpop.permute.xlu0 %178 }
 0x110   :  { %v190_v18 = vmax.f32 %v186_v15, 0.0  ;;  %v187_v19 = vadd.f32 %v179_v16, %v147_v13  ;;  %v193_v20 = vmul.f32 %v189_v14, %v33_v12 }
 0x112   :  { %v191_v22 = vmax.f32 %v187_v19, 0.0  ;;  %v200_v23 = vsel %vm196_vm0, %v193_v20, 0.0  ;;  %v194_v24 = vmul.f32 %v190_v18, %v34_v17 }
 0x113   :  { %201 = vadd.xlane.f32.xlu0 %v200_v23 }
 0x114   :  { %v195_v25 = vmul.f32 %v191_v22, %v35_v21  ;;  %v203_v26 = vsel %vm196_vm0, %v194_v24, 0.0 }
 0x116   :  { %v206_v27 = vsel %vm196_vm0, %v195_v25, 0.0 }
 0x117   :  { %204 = vadd.xlane.f32.xlu0 %v203_v26  ;;  %207 = vadd.xlane.f32.xlu1 %v206_v27 }
 0x18e   :  { %v199_v29 = vpop.xlane.xlu1 %198 }
 0x18f   :  { %v209_v30 = vadd.f32 %v199_v29, %v36_v28 }
 0x191   :  { %214 = vst.msk [vmem:[#allocation2] sm:$0xff] %vm213_vm1, %v209_v30 }
 0x198   :  { %v236_v31 = vld [vmem:[#allocation2] sm:$0x3] }
 0x199   :  { %237 = vst [vmem:[%s380_s5] sm:$0x3] %v236_v31 }
 0x19c   :  { %v202_v32 = vpop.xlane.xlu0 %201 }
 0x1a0   :  { %v208_v33 = vpop.xlane.xlu1 %207  ;;  %v205_v34 = vpop.xlane.xlu0 %204 }

</bundles_post_ra>
